<compile_context>
chip_gen: v5e
topology: v5e:2x2
jax: 0.10.0
libtpu: 0.0.40
codegen_flags: <defaults>
</compile_context>

<pallas_src>
import functools

import jax
import jax.numpy as jnp
from jax import lax
from jax.experimental import pallas as pl
from jax.experimental.pallas import tpu as pltpu


def _rmsnorm_kernel(x_ref, g_ref, o_ref, *, inv_eps):
    # x_ref: (tile_rows, dim_p); g_ref: (1, dim_p), already f32 and scaled by
    # sqrt(dim). Ragged last block: Pallas masks the writeback of out-of-range
    # rows, so any NaN/inf produced by rsqrt on garbage pad rows never lands in
    # HBM. Do NOT add cross-row reductions here without revisiting that.
    x = x_ref[...].astype(jnp.float32)
    sumsq = jnp.sum(x * x, axis=-1, keepdims=True)          # (tile_rows, 1)
    # 1 / max(||x||_2, eps) == min(rsqrt(sum x^2), 1/eps); rsqrt runs on the EUP.
    inv = jnp.minimum(lax.rsqrt(sumsq), inv_eps)            # (tile_rows, 1)
    o_ref[...] = ((x * inv) * g_ref[...]).astype(o_ref.dtype)


def _round_up(v, m):
    return ((v + m - 1) // m) * m


def _tpu_generation():
    """Returns (vmem_capacity_bytes, is_v7x_like)."""
    vmem = 64 * 1024 * 1024      # conservative fallback (v7x per-TC)
    is_v7x = True                # conservative: smaller VMEM, 2 TCs assumed
    try:
        info = pltpu.get_tpu_info()
        vmem = int(getattr(info, "vmem_capacity_bytes", vmem))
        cv = getattr(info, "chip_version", None)
        name = str(getattr(cv, "name", cv)) if cv is not None else ""
        if name:
            is_v7x = "7" in name
        else:
            # v7x has 64 MiB per TC; v5e/v6e have 128 MiB.
            is_v7x = vmem <= 96 * 1024 * 1024
    except Exception:
        pass
    return vmem, is_v7x


def _choose_tile_rows(rows, dim_p, itemsize, requested, vmem_cap, is_v7x):
    rows_up = _round_up(max(rows, 1), 8)

    # Budget = quarter of VMEM; per-row bytes model the double-buffered input
    # and output tiles plus ~two f32 full-tile temporaries (the upcast of x and
    # the x*inv product) so the max tile stays spill-free.
    budget = vmem_cap // 4
    per_row = dim_p * (4 * itemsize + 8)
    max_tr_budget = max(8, (budget // max(per_row, 1)) // 8 * 8)

    if requested is not None:
        tr = max(8, (int(requested) // 8) * 8)
        # Re-fit a user tile against this generation's VMEM budget (a tile that
        # fits v5e/v6e's 128 MiB may not fit v7x's 64 MiB per-TC VMEM).
        return max(8, min(tr, max_tr_budget, rows_up))

    # Bytes-per-block target: ~4 MiB/buffer on v5e/v6e, ~8 MiB on v7x (its HBM
    # is ~2.3x faster while the ~0.35us grid-step overhead is unchanged).
    target_bytes = (8 << 20) if is_v7x else (4 << 20)
    tr_target = max(8, (target_bytes // max(dim_p * itemsize, 1)) // 8 * 8)

    tr = max(8, min(max_tr_budget, tr_target, rows_up))

    # v7x only: keep >= 4 grid steps (>= 2 blocks per TensorCore) when there is
    # enough work, so each core has prefetch/writeback overlap under
    # dimension_semantics=("parallel",). On v5e/v6e (1 TC) splitting a
    # fits-in-one-tile input only adds step overhead, so don't.
    if is_v7x and rows_up >= 4 * 8:
        max_tr_for_steps = max(8, (rows_up // 4) // 8 * 8)
        tr = min(tr, max_tr_for_steps)

    # Rebalance so grid steps are roughly equal-sized (never increases tr).
    steps = pl.cdiv(rows_up, tr)
    tr = min(tr, max(8, _round_up(pl.cdiv(rows_up, steps), 8)))
    return max(8, min(tr, rows_up))


def rmsnorm(x, gamma, *, eps=1e-12, tile_rows=None):
    """x: (..., dim), gamma: (dim,).

    Matches the reference module's forward exactly:
        F.normalize(x, dim=-1) * sqrt(dim) * gamma
    (eps clamps the L2 norm, as in F.normalize; this is not torch.nn.RMSNorm).
    """
    orig_shape = x.shape
    dim = orig_shape[-1]
    scale = float(dim) ** 0.5

    x2d = x.reshape(-1, dim)
    rows = x2d.shape[0]
    itemsize = jnp.dtype(x.dtype).itemsize

    # Lane-dense layout: pad the feature axis to a multiple of 128. Zero columns
    # contribute 0 to sum(x^2) and padded gamma is 0, so results are unchanged;
    # stores become unmasked vst instead of vst.msk.
    dim_p = _round_up(dim, 128)
    if dim_p != dim:
        x2d = jnp.pad(x2d, ((0, 0), (0, dim_p - dim)))

    # Fold sqrt(dim) into gamma once, pre-cast to f32, pad lanes with zeros.
    g = gamma.astype(jnp.float32) * scale
    if dim_p != dim:
        g = jnp.pad(g, (0, dim_p - dim))
    g2d = g.reshape(1, dim_p)

    vmem_cap, is_v7x = _tpu_generation()
    tr = _choose_tile_rows(rows, dim_p, itemsize, tile_rows, vmem_cap, is_v7x)
    grid = pl.cdiv(rows, tr)

    # Scoped-VMEM limit: cover double-buffered in/out tiles plus f32 temps, with
    # headroom; never request more than ~85% of physical per-TC VMEM.
    io_bytes = 2 * 2 * tr * dim_p * itemsize          # dbl-buffered in + out
    temp_bytes = 2 * tr * dim_p * 4                   # f32 temporaries
    vmem_limit = min(int(vmem_cap * 0.85),
                     max(32 * 1024 * 1024, int(1.25 * (io_bytes + temp_bytes))))

    kernel = functools.partial(_rmsnorm_kernel, inv_eps=float(1.0 / eps))

    out = pl.pallas_call(
        kernel,
        out_shape=jax.ShapeDtypeStruct((rows, dim_p), x.dtype),
        grid_spec=pltpu.PrefetchScalarGridSpec(
            num_scalar_prefetch=0,
            grid=(grid,),
            in_specs=[
                pl.BlockSpec((tr, dim_p), lambda i: (i, 0)),
                pl.BlockSpec((1, dim_p), lambda i: (0, 0)),
            ],
            out_specs=pl.BlockSpec((tr, dim_p), lambda i: (i, 0)),
        ),
        compiler_params=pltpu.CompilerParams(
            dimension_semantics=("parallel",),
            vmem_limit_bytes=int(vmem_limit),
        ),
    )(x2d, g2d)

    if dim_p != dim:
        out = out[:, :dim]
    return out.reshape(orig_shape)


if __name__ == "__main__":
    key = jax.random.PRNGKey(0)
    batch, seq, dim = 2, 8, 32

    x = jax.random.normal(key, (batch, seq, dim), dtype=jnp.float32)
    # nn.Parameter(torch.ones(dim)) — deterministic init of ones.
    gamma = jnp.ones((dim,), dtype=jnp.float32)

    y = rmsnorm(x, gamma)
    jax.block_until_ready(y)

    # Pure-JAX reference (F.normalize semantics).
    norm = jnp.maximum(
        jnp.sqrt(jnp.sum(x.astype(jnp.float32) ** 2, axis=-1, keepdims=True)),
        1e-12,
    )
    ref = (x / norm) * (dim ** 0.5) * gamma
    assert jnp.allclose(y, ref, atol=1e-5, rtol=1e-5), "mismatch vs reference"

    print("KERNEL_OK")
</pallas_src>

<mosaic_0001>
module attributes {stable_mosaic.version = 11 : i64} {
  func.func @_rmsnorm_kernel(%arg0: i32, %arg1: memref<16x128xf32, #tpu.memory_space<vmem>>, %arg2: memref<1x128xf32, #tpu.memory_space<vmem>>, %arg3: memref<16x128xf32, #tpu.memory_space<vmem>>) attributes {dimension_semantics = [#tpu.dimension_semantics<parallel>], iteration_bounds = array<i64: 1>, scalar_prefetch = 0 : i64, scratch_operands = 0 : i64, tpu.core_type = #tpu.core_type<tc>, window_params = [{transform_indices = @transform_0, window_bounds = array<i64: 16, 128>}, {pipeline_mode = #tpu.pipeline_mode<synchronous>, transform_indices = @transform_1, window_bounds = array<i64: 1, 128>}, {transform_indices = @transform_2, window_bounds = array<i64: 16, 128>}]} {
    %c0 = arith.constant 0 : index
    %c0_0 = arith.constant 0 : index
    %0 = vector.load %arg1[%c0, %c0_0] : memref<16x128xf32, #tpu.memory_space<vmem>>, vector<16x128xf32>
    %1 = arith.mulf %0, %0 : vector<16x128xf32>
    %cst = arith.constant dense<0.000000e+00> : vector<16xf32>
    %2 = vector.multi_reduction <add>, %1, %cst [1] : vector<16x128xf32> to vector<16xf32>
    %3 = vector.shape_cast %2 : vector<16xf32> to vector<16x1xf32>
    %4 = math.rsqrt %3 : vector<16x1xf32>
    %cst_1 = arith.constant 9.99999995E+11 : f32
    %5 = vector.broadcast %cst_1 : f32 to vector<16x1xf32>
    %6 = arith.minimumf %4, %5 : vector<16x1xf32>
    %7 = vector.broadcast %6 : vector<16x1xf32> to vector<16x128xf32>
    %8 = arith.mulf %0, %7 : vector<16x128xf32>
    %c0_2 = arith.constant 0 : index
    %c0_3 = arith.constant 0 : index
    %9 = vector.load %arg2[%c0_2, %c0_3] : memref<1x128xf32, #tpu.memory_space<vmem>>, vector<1x128xf32>
    %10 = vector.broadcast %9 : vector<1x128xf32> to vector<16x128xf32>
    %11 = arith.mulf %8, %10 : vector<16x128xf32>
    %c0_4 = arith.constant 0 : index
    %c0_5 = arith.constant 0 : index
    %12 = vector.load %arg3[%c0_4, %c0_5] : memref<16x128xf32, #tpu.memory_space<vmem>>, vector<16x128xf32>
    tpu.vector_store %arg3[%c0_4, %c0_5], %11 {strides = array<i32>} : memref<16x128xf32, #tpu.memory_space<vmem>>, vector<16x128xf32>,
    return
  }
  func.func @transform_0(%arg0: i32) -> (i32, i32) {
    %c0_i32 = arith.constant 0 : i32
    %c0_i32_0 = arith.constant 0 : i32
    return %arg0, %c0_i32 : i32, i32
  }
  func.func @transform_1(%arg0: i32) -> (i32, i32) {
    %c0_i32 = arith.constant 0 : i32
    %c0_i32_0 = arith.constant 0 : i32
    %c0_i32_1 = arith.constant 0 : i32
    return %c0_i32, %c0_i32_0 : i32, i32
  }
  func.func @transform_2(%arg0: i32) -> (i32, i32) {
    %c0_i32 = arith.constant 0 : i32
    %c0_i32_0 = arith.constant 0 : i32
    return %arg0, %c0_i32 : i32, i32
  }
}

</mosaic_0001>

<bundles_post_ra>
// kernel: tpu_custom_call.1
= control target key start
LH: loop header
LB: loop body
LE: loop exit
PB: predicated region body
PF: predicated region fallthrough
CT: control target
= control target key end

     0   :  { %7 = vsyncpa [#allocation3], 0  ;;  %s225_s0 = inlined_call_operand.hbm [shape: f32[16,128], index: 0, kind: input, shape index: {}]   ;;  %s226_s1 = inlined_call_operand.hbm [shape: f32[1,128], index: 1, kind: input, shape index: {}]   ;;  %s227_s2 = inlined_call_operand.hbm [shape: f32[16,128], index: 2, kind: output, shape index: {}]  }
   0x1   :  { %8 = vsyncpa [#allocation6], 0 }
   0x2   :  { %9 = vsyncpa [#allocation4], 0  ;;  %s14_s11 = sshll.u32 %s225_s0, 4  ;;  %s190_s12 = smov [#allocation2]   ;;  %s15_s11 = int_to_ptr.hbm [resolvable:$true] %s14_s11 }
   0x3   :  { %s16_s13 = sshll.u32 %s190_s12, 4  ;;  %s28_s16 = sshll.u32 %s226_s1, 4  ;;  %s17_s13 = int_to_ptr.vmem [resolvable:$true] %s16_s13  ;;  %s29_s16 = int_to_ptr.hbm [resolvable:$true] %s28_s16 }
   0x4   :  { %s191_s17 = smov 128   ;;  %s192_s18 = smov 8  }
   0x5   :  { %22 = dma.hbm_to_vmem [thread:$0]  %s15_s11, 256, %s17_s13, [#allocation3], %s191_s17, %s191_s17, %s192_s18  }
   0x6   :  { %s193_s19 = smov [#allocation5]  }
   0x7   :  { %s30_s20 = sshll.u32 %s193_s19, 4  ;;  %s31_s20 = int_to_ptr.vmem [resolvable:$true] %s30_s20 }
   0x8   :  { %33 = dma.hbm_to_vmem [thread:$0]  %s29_s16, 16, %s31_s20, [#allocation6]  }
   0x9   :  { %184 = dma.done.wait [#allocation3], 256  }
   0xa   :  { %185 = vsyncadd [#allocation3], 4294967040 }
   0xb   :  { %186 = dma.done.wait [#allocation6], 16  }
   0xc   :  { %187 = vsyncadd [#allocation6], 4294967280  ;;  %v42_v0 = vld [vmem:[#allocation2] sm:$0xff]  ;;  %v43_v2 = vld [vmem:[#allocation2 + $0x8] sm:$0xff]  ;;  %s194_s0 = smov [#allocation7]   ;;  %s88_s23 = sshll.u32 %s227_s2, 4  ;;  %s89_s23 = int_to_ptr.hbm [resolvable:$true] %s88_s23 }
   0xd   :  { %v44_v1 = vmul.f32 %v42_v0, %v42_v0  ;;  %v45_v3 = vmul.f32 %v43_v2, %v43_v2  ;;  %v107_v17 = vld [vmem:[#allocation5] ss:$0 sm:$0xff]  ;;  %s86_s1 = sshll.u32 %s194_s0, 4  ;;  %s87_s1 = int_to_ptr.vmem [resolvable:$true] %s86_s1 }
   0xf   :  { %46 = vadd.xlane.f32.xlu0 %v44_v1 }
  0x17   :  { %48 = vadd.xlane.f32.xlu0 %v45_v3 }
  0x82   :  { %v47_v4 = vpop.xlane.xlu0 %46 }
  0x83   :  { %108 = vrsqrt.f32 %v47_v4  ;;  %vm56_vm1 = vweird.f32 %v47_v4 }
  0x89   :  { %v109_v5 = vpop.eup %108 }
  0x8a   :  { %v51_v6 = vmul.f32 %v109_v5, %v47_v4  ;;  %v49_v7 = vpop.xlane.xlu0 %48  ;;  %vm57_vm0 = vweird.f32 %v109_v5 }
  0x8b   :  { %110 = vrsqrt.f32 %v49_v7  ;;  %vm58_vm2 = vmor %vm56_vm1, %vm57_vm0  ;;  %vm66_vm4 = vweird.f32 %v49_v7 }
  0x8c   :  { %v52_v8 = vmul.f32 %v109_v5, %v51_v6 }
  0x8e   :  { %v53_v9 = vmul.f32 0.5, %v52_v8 }
  0x90   :  { %v54_v10 = vsub.f32 1.5, %v53_v9 }
  0x91   :  { %v111_v11 = vpop.eup %110 }
  0x92   :  { %v55_v12 = vmul.f32 %v109_v5, %v54_v10  ;;  %v61_v13 = vmul.f32 %v111_v11, %v49_v7  ;;  %vm67_vm3 = vweird.f32 %v111_v11 }
  0x93   :  { %vm68_vm5 = vmor %vm66_vm4, %vm67_vm3 }
  0x94   :  { %v59_v14 = vsel %vm58_vm2, %v109_v5, %v55_v12  ;;  %v62_v15 = vmul.f32 %v111_v11, %v61_v13 }
  0x95   :  { %v70_v16 = vmin.f32 %v59_v14, 1e+12 }
  0x96   :  { %v63_v18 = vmul.f32 0.5, %v62_v15 }
  0x97   :  { %v72_v19 = vmul.f32 %v70_v16, %v42_v0 }
  0x98   :  { %v64_v20 = vsub.f32 1.5, %v63_v18 }
  0x99   :  { %v78_v21 = vmul.f32 %v107_v17, %v72_v19 }
  0x9a   :  { %v65_v22 = vmul.f32 %v111_v11, %v64_v20 }
  0x9b   :  { %80 = vst [vmem:[#allocation7] sm:$0xff] %v78_v21 }
  0x9c   :  { %v69_v23 = vsel %vm68_vm5, %v111_v11, %v65_v22 }
  0x9d   :  { %v71_v24 = vmin.f32 %v69_v23, 1e+12 }
  0x9f   :  { %v73_v25 = vmul.f32 %v71_v24, %v43_v2 }
  0xa1   :  { %v79_v26 = vmul.f32 %v107_v17, %v73_v25 }
  0xa3   :  { %81 = vst [vmem:[#allocation7 + $0x8] sm:$0xff] %v79_v26 }
  0xa4   :  { %94 = dma.vmem_to_hbm [thread:$0]  %s87_s1, 256, %s89_s23, [#allocation4], %s191_s17, %s191_s17, %s192_s18  }
  0xa5   :  { %188 = dma.done.wait [#allocation4], 256  }
  0xa6   :  { %189 = vsyncadd [#allocation4], 4294967040 }
  0xa7   :  { %99 = vsyncpa [#allocation3], 1 }
  0xa8   :  { %100 = vsyncpa [#allocation6], 1 }
  0xa9   :  { %101 = vsyncpa [#allocation4], 1 }

</bundles_post_ra>
